<compile_context>
chip_gen: v7x
topology: tpu7x:2x2x1
jax: 0.10.0
libtpu: 0.0.40
codegen_flags: <defaults>
</compile_context>

<pallas_src>
import math

import jax
import jax.numpy as jnp
from jax.experimental import pallas as pl
from jax.experimental.pallas import tpu as pltpu

_LANES = 128


def _symbol_encoding_dma_kernel(pos_hbm, out_hbm, sem):
    # Forward pass of SymbolEncoding: identity read-out of the parameter.
    # One HBM->HBM DMA; no VMEM staging, no vector-slot work.
    cp = pltpu.make_async_copy(pos_hbm, out_hbm, sem)
    cp.start()
    cp.wait()


@jax.jit
def symbol_encoding_forward(position_embeddings: jax.Array) -> jax.Array:
    """Pallas implementation of SymbolEncoding.forward().

    NOTE: in production the right move is to simply `return position_embeddings`
    (or fuse the read into the consumer kernel as an extra VMEM-resident
    in_spec); the kernel below is the minimal-overhead materializing copy.
    """
    shape = position_embeddings.shape
    dtype = position_embeddings.dtype
    n = math.prod(shape)

    # Lane-dense presentation when possible: (1, 32, 4, 24) -> (24, 128).
    # Reshape of a contiguous array is free (metadata only).  When n is not a
    # multiple of 128 we pass the original shape directly — the DMA engine does
    # not care about lane alignment (no vector stores are involved).
    if n % _LANES == 0:
        work_shape = (n // _LANES, _LANES)
    else:
        work_shape = shape

    x = position_embeddings.reshape(work_shape)

    out = pl.pallas_call(
        _symbol_encoding_dma_kernel,
        out_shape=jax.ShapeDtypeStruct(work_shape, dtype),
        # Both operands stay in HBM; the kernel issues a single direct DMA.
        in_specs=[pl.BlockSpec(memory_space=pl.ANY)],
        out_specs=pl.BlockSpec(memory_space=pl.ANY),
        scratch_shapes=[pltpu.SemaphoreType.DMA],
    )(x)

    return out.reshape(shape)


def init_position_embeddings(key, num_contexts=4, d_model=32, f_len=24,
                             dtype=jnp.float32):
    """xavier_uniform_ init matching nn.init.xavier_uniform_ semantics for a
    tensor of shape (1, d_model, num_contexts, f_len)."""
    shape = (1, d_model, num_contexts, f_len)
    receptive_field = num_contexts * f_len
    fan_in = d_model * receptive_field     # shape[1] * receptive field
    fan_out = 1 * receptive_field          # shape[0] * receptive field
    gain = 1.0
    std = gain * math.sqrt(2.0 / (fan_in + fan_out))
    a = math.sqrt(3.0) * std
    return jax.random.uniform(key, shape, dtype=dtype, minval=-a, maxval=a)


if __name__ == "__main__":
    key = jax.random.PRNGKey(0)

    num_contexts, d_model, f_len = 4, 32, 24
    position_embeddings = init_position_embeddings(
        key, num_contexts=num_contexts, d_model=d_model, f_len=f_len)

    out = symbol_encoding_forward(position_embeddings)
    out = jax.block_until_ready(out)

    # Correctness check against the trivial reference (forward == parameter).
    assert out.shape == (1, d_model, num_contexts, f_len)
    assert out.dtype == position_embeddings.dtype
    assert jnp.array_equal(out, position_embeddings)

    print("KERNEL_OK")
</pallas_src>

<mosaic_0001>
module attributes {stable_mosaic.version = 11 : i64} {
  func.func @_symbol_encoding_dma_kernel(%arg0: memref<24x128xf32, #tpu.memory_space<any>>, %arg1: memref<24x128xf32, #tpu.memory_space<any>>, %arg2: memref<!tpu.dma_semaphore, #tpu.memory_space<semaphore_mem>>) attributes {dimension_semantics = [], scalar_prefetch = 0 : i64, scratch_operands = 1 : i64, tpu.core_type = #tpu.core_type<tc>} {
    tpu.enqueue_dma source(%arg0 : memref<24x128xf32, #tpu.memory_space<any>>) target(%arg1 : memref<24x128xf32, #tpu.memory_space<any>>) target_semaphore(%arg2 : memref<!tpu.dma_semaphore, #tpu.memory_space<semaphore_mem>>)
    tpu.wait_dma2 semaphore(%arg2 : memref<!tpu.dma_semaphore, #tpu.memory_space<semaphore_mem>>) src(%arg0 : memref<24x128xf32, #tpu.memory_space<any>>) dst(%arg1 : memref<24x128xf32, #tpu.memory_space<any>>)
    return
  }
}

</mosaic_0001>

<bundles_post_ra>
// kernel: symbol_encoding_forward.1
= control target key start
LH: loop header
LB: loop body
LE: loop exit
PB: predicated region body
PF: predicated region fallthrough
CT: control target
= control target key end

     0   :  { %s100_s0 = inlined_call_operand.vmem [shape: f32[24,128], index: 0, kind: input, shape index: {}]   ;;  %s101_s1 = inlined_call_operand.vmem [shape: f32[24,128], index: 1, kind: output, shape index: {}]  }
   0x1   :  { %v38_v0 = vld [vmem:[%s100_s0] sm:$0xff]  ;;  %v40_v1 = vld [vmem:[%s100_s0 + $0x8] sm:$0xff]  ;;  %v42_v2 = vld [vmem:[%s100_s0 + $0x10] sm:$0xff] }
   0x2   :  { %39 = vst [vmem:[%s101_s1] sm:$0xff] %v38_v0  ;;  %41 = vst [vmem:[%s101_s1 + $0x8] sm:$0xff] %v40_v1 }
   0x3   :  { %43 = vst [vmem:[%s101_s1 + $0x10] sm:$0xff] %v42_v2 }
   0x4   :  { %51 = vsyncadd [#allocation2], 384 }
   0x5   :  { %70 = dma.done.wait [#allocation2], 384 }
   0x6   :  { %71 = vsyncadd [#allocation2], 4294966912 }
   0x7   :  { %55 = vsyncmov [#allocation2] }
   0xa   :  { %s56_s18 = vpop.sfrf %55 }
   0xb   :  { %p69_p0 = scmp.ne.s32.totalorder %s56_s18, 0 }
   0xd   :  { %60 = shalt.err (%p69_p0)  }

</bundles_post_ra>
